<compile_context>
chip_gen: v5e
topology: v5e:2x2
jax: 0.10.0
libtpu: 0.0.40
codegen_flags: <defaults>
</compile_context>

<pallas_src>
import functools

import jax
import jax.numpy as jnp
from jax.experimental import pallas as pl
from jax.experimental.pallas import tpu as pltpu


def _layernorm_kernel(x_ref, g_ref, b_ref, o_ref, *, eps, n):
    x = x_ref[...].astype(jnp.float32)          # (tile_rows, F)
    g = g_ref[...].astype(jnp.float32)          # (1, F)
    b = b_ref[...].astype(jnp.float32)          # (1, F)

    mean = jnp.sum(x, axis=-1, keepdims=True) * (1.0 / n)
    diff = x - mean
    # Two-pass variance kept intentionally (see header): robust to |mean| >> std.
    # torch.std default is unbiased (Bessel's correction): divide by N-1.
    var = jnp.sum(diff * diff, axis=-1, keepdims=True) * (1.0 / (n - 1))
    std = jnp.sqrt(var)
    # One per-row reciprocal instead of F divides per row. approx=False is an
    # exact divide (VALU), not EUP vrcp; cost is negligible on a (rows, 1) tensor
    # and keeps the 1e-5 reference tolerance tight.
    inv = pl.reciprocal(std + eps, approx=False)      # (tile_rows, 1)
    o_ref[...] = (diff * inv * g + b).astype(o_ref.dtype)


def _chip_tuning():
    """Per-generation tile / VMEM targets. Falls back to conservative defaults."""
    kind = ""
    try:
        kind = jax.devices()[0].device_kind.lower()
    except Exception:
        pass
    if "v7" in kind:
        # 3.2 TB/s HBM -> need bigger tiles to amortize ~0.35us/step overhead,
        # but only 64 MiB physical VMEM per TC -> keep the cap at 48 MiB.
        return {"target_tile_bytes": 8 << 20, "vmem_cap": 48 << 20, "num_tc": 2}
    # v5e / v6e / unknown: 128 MiB VMEM, 0.8-1.4 TB/s HBM.
    return {"target_tile_bytes": 4 << 20, "vmem_cap": 96 << 20, "num_tc": 1}


def _sublane_multiple(itemsize):
    """Sublane packing multiple for the dtype (f32=8, bf16=16, int8/fp8=32)."""
    if itemsize >= 4:
        return 8
    if itemsize == 2:
        return 16
    return 32


def _pick_tile_rows(rows, features, itemsize, *, target_tile_bytes, num_tc,
                    max_rows=4096):
    """Largest row tile within the byte budget, sublane-aligned, with a minimum
    grid length of ~4 steps per TensorCore so pipelining/megacore stay fed."""
    mult = _sublane_multiple(itemsize)

    # Byte-budget-driven tile, rounded down to the sublane packing multiple.
    t = target_tile_bytes // max(1, features * itemsize)
    t = max(mult, min(max_rows, (t // mult) * mult))

    # Keep grid >= 4 * num_tc steps (when the input is big enough to allow it),
    # so one TC doesn't idle and the double-buffer pipeline has a steady state.
    min_steps = 4 * num_tc
    cap = (rows // min_steps // mult) * mult
    if cap >= mult:
        t = min(t, cap)

    if t >= rows:
        # Single block covering the full row extent (block == full dim is legal
        # even when rows is not a multiple of the sublane packing).
        return rows
    return t


def layer_norm(x, gamma, beta, eps=1e-6, *, tile_rows=None):
    """LayerNorm over the last axis of x (any leading shape), torch.std semantics."""
    orig_shape = x.shape
    features = orig_shape[-1]
    x2 = x.reshape(-1, features)
    rows = x2.shape[0]
    itemsize = jnp.dtype(x2.dtype).itemsize

    tuning = _chip_tuning()
    if tile_rows is None:
        tile_rows = _pick_tile_rows(
            rows, features, itemsize,
            target_tile_bytes=tuning["target_tile_bytes"],
            num_tc=tuning["num_tc"])
    tile_rows = min(tile_rows, rows)

    g2 = gamma.reshape(1, features)
    b2 = beta.reshape(1, features)

    # Boundary block (if rows % tile_rows != 0) is handled by Pallas masking:
    # out-of-bounds rows are never written back, and rows are independent,
    # so no host-side padding copy is needed.
    grid = (pl.cdiv(rows, tile_rows),)

    # VMEM budget: double-buffered x tile + double-buffered out tile + params,
    # with headroom; capped per generation (48 MiB on v7x's 64 MiB VMEM,
    # 96 MiB on 128 MiB-VMEM chips).
    io_bytes = 2 * 2 * tile_rows * features * itemsize
    param_bytes = 2 * 2 * features * 4
    vmem_limit = int(min(tuning["vmem_cap"],
                         max(32 << 20, 2 * io_bytes + param_bytes)))

    kernel = functools.partial(_layernorm_kernel, eps=eps, n=features)

    out = pl.pallas_call(
        kernel,
        out_shape=jax.ShapeDtypeStruct((rows, features), x.dtype),
        grid_spec=pltpu.PrefetchScalarGridSpec(
            num_scalar_prefetch=0,
            grid=grid,
            in_specs=[
                pl.BlockSpec((tile_rows, features), lambda i: (i, 0)),
                pl.BlockSpec((1, features), lambda i: (0, 0)),
                pl.BlockSpec((1, features), lambda i: (0, 0)),
            ],
            out_specs=pl.BlockSpec((tile_rows, features), lambda i: (i, 0)),
        ),
        compiler_params=pltpu.CompilerParams(
            dimension_semantics=("parallel",),   # row tiles shard across TCs
            vmem_limit_bytes=vmem_limit,
        ),
    )(x2, g2, b2)

    return out.reshape(orig_shape)


if __name__ == "__main__":
    key = jax.random.PRNGKey(0)
    # Lane-dense demo shape: features is a multiple of 128 so every vector
    # load/store is a full (unmasked) vreg. Kernel also works for smaller F.
    batch, seq, features = 2, 8, 256
    x = jax.random.normal(key, (batch, seq, features), dtype=jnp.float32)

    # deterministic parameter init, matching nn.Parameter(torch.ones/zeros(features))
    gamma = jnp.ones((features,), dtype=jnp.float32)
    beta = jnp.zeros((features,), dtype=jnp.float32)
    eps = 1e-6

    out = layer_norm(x, gamma, beta, eps)
    out = jax.block_until_ready(out)

    # reference check in plain JAX (unbiased std, eps added to std — torch.std semantics)
    mean = jnp.mean(x, axis=-1, keepdims=True)
    std = jnp.sqrt(jnp.sum((x - mean) ** 2, axis=-1, keepdims=True) / (features - 1))
    ref = gamma * (x - mean) / (std + eps) + beta
    assert jnp.allclose(out, ref, atol=1e-5, rtol=1e-5), "mismatch vs reference"

    # also exercise a non-divisible row count (partial boundary block path)
    x_odd = jax.random.normal(jax.random.PRNGKey(1), (3, 7, features), jnp.float32)
    out_odd = jax.block_until_ready(
        layer_norm(x_odd, gamma, beta, eps, tile_rows=8))
    mean_o = jnp.mean(x_odd, axis=-1, keepdims=True)
    std_o = jnp.sqrt(
        jnp.sum((x_odd - mean_o) ** 2, axis=-1, keepdims=True) / (features - 1))
    ref_o = gamma * (x_odd - mean_o) / (std_o + eps) + beta
    assert jnp.allclose(out_odd, ref_o, atol=1e-5, rtol=1e-5), "mismatch (partial tile)"

    # exercise a bf16 input (16-row sublane packing path) and auto-sized tiles
    x_bf = jax.random.normal(jax.random.PRNGKey(2), (4, 64, features), jnp.bfloat16)
    out_bf = jax.block_until_ready(layer_norm(x_bf, gamma, beta, eps))
    xb = x_bf.astype(jnp.float32)
    mean_b = jnp.mean(xb, axis=-1, keepdims=True)
    std_b = jnp.sqrt(jnp.sum((xb - mean_b) ** 2, axis=-1, keepdims=True) / (features - 1))
    ref_b = (gamma * (xb - mean_b) / (std_b + eps) + beta).astype(jnp.bfloat16)
    assert jnp.allclose(out_bf.astype(jnp.float32), ref_b.astype(jnp.float32),
                        atol=2e-2, rtol=2e-2), "mismatch (bf16)"

    print("KERNEL_OK")
</pallas_src>

<mosaic_0001>
module attributes {stable_mosaic.version = 11 : i64} {
  func.func @_layernorm_kernel(%arg0: i32, %arg1: memref<16x256xf32, #tpu.memory_space<vmem>>, %arg2: memref<1x256xf32, #tpu.memory_space<vmem>>, %arg3: memref<1x256xf32, #tpu.memory_space<vmem>>, %arg4: memref<16x256xf32, #tpu.memory_space<vmem>>) attributes {dimension_semantics = [#tpu.dimension_semantics<parallel>], iteration_bounds = array<i64: 1>, scalar_prefetch = 0 : i64, scratch_operands = 0 : i64, tpu.core_type = #tpu.core_type<tc>, window_params = [{transform_indices = @transform_0, window_bounds = array<i64: 16, 256>}, {pipeline_mode = #tpu.pipeline_mode<synchronous>, transform_indices = @transform_1, window_bounds = array<i64: 1, 256>}, {pipeline_mode = #tpu.pipeline_mode<synchronous>, transform_indices = @transform_2, window_bounds = array<i64: 1, 256>}, {transform_indices = @transform_3, window_bounds = array<i64: 16, 256>}]} {
    %c0 = arith.constant 0 : index
    %c0_0 = arith.constant 0 : index
    %0 = vector.load %arg1[%c0, %c0_0] : memref<16x256xf32, #tpu.memory_space<vmem>>, vector<16x256xf32>
    %c0_1 = arith.constant 0 : index
    %c0_2 = arith.constant 0 : index
    %1 = vector.load %arg2[%c0_1, %c0_2] : memref<1x256xf32, #tpu.memory_space<vmem>>, vector<1x256xf32>
    %c0_3 = arith.constant 0 : index
    %c0_4 = arith.constant 0 : index
    %2 = vector.load %arg3[%c0_3, %c0_4] : memref<1x256xf32, #tpu.memory_space<vmem>>, vector<1x256xf32>
    %cst = arith.constant dense<0.000000e+00> : vector<16xf32>
    %3 = vector.multi_reduction <add>, %0, %cst [1] : vector<16x256xf32> to vector<16xf32>
    %4 = vector.shape_cast %3 : vector<16xf32> to vector<16x1xf32>
    %cst_5 = arith.constant 3.906250e-03 : f32
    %5 = vector.broadcast %cst_5 : f32 to vector<16x1xf32>
    %6 = arith.mulf %4, %5 : vector<16x1xf32>
    %7 = vector.broadcast %6 : vector<16x1xf32> to vector<16x256xf32>
    %8 = arith.subf %0, %7 : vector<16x256xf32>
    %9 = arith.mulf %8, %8 : vector<16x256xf32>
    %cst_6 = arith.constant dense<0.000000e+00> : vector<16xf32>
    %10 = vector.multi_reduction <add>, %9, %cst_6 [1] : vector<16x256xf32> to vector<16xf32>
    %11 = vector.shape_cast %10 : vector<16xf32> to vector<16x1xf32>
    %cst_7 = arith.constant 0.00392156886 : f32
    %12 = vector.broadcast %cst_7 : f32 to vector<16x1xf32>
    %13 = arith.mulf %11, %12 : vector<16x1xf32>
    %14 = math.sqrt %13 : vector<16x1xf32>
    %cst_8 = arith.constant 9.99999997E-7 : f32
    %15 = vector.broadcast %cst_8 : f32 to vector<16x1xf32>
    %16 = arith.addf %14, %15 : vector<16x1xf32>
    %17 = tpu.reciprocal %16 : vector<16x1xf32> -> vector<16x1xf32>
    %18 = vector.broadcast %17 : vector<16x1xf32> to vector<16x256xf32>
    %19 = arith.mulf %8, %18 : vector<16x256xf32>
    %20 = vector.broadcast %1 : vector<1x256xf32> to vector<16x256xf32>
    %21 = arith.mulf %19, %20 : vector<16x256xf32>
    %22 = vector.broadcast %2 : vector<1x256xf32> to vector<16x256xf32>
    %23 = arith.addf %21, %22 : vector<16x256xf32>
    %c0_9 = arith.constant 0 : index
    %c0_10 = arith.constant 0 : index
    %24 = vector.load %arg4[%c0_9, %c0_10] : memref<16x256xf32, #tpu.memory_space<vmem>>, vector<16x256xf32>
    tpu.vector_store %arg4[%c0_9, %c0_10], %23 {strides = array<i32>} : memref<16x256xf32, #tpu.memory_space<vmem>>, vector<16x256xf32>,
    return
  }
  func.func @transform_0(%arg0: i32) -> (i32, i32) {
    %c0_i32 = arith.constant 0 : i32
    %c0_i32_0 = arith.constant 0 : i32
    return %arg0, %c0_i32 : i32, i32
  }
  func.func @transform_1(%arg0: i32) -> (i32, i32) {
    %c0_i32 = arith.constant 0 : i32
    %c0_i32_0 = arith.constant 0 : i32
    %c0_i32_1 = arith.constant 0 : i32
    return %c0_i32, %c0_i32_0 : i32, i32
  }
  func.func @transform_2(%arg0: i32) -> (i32, i32) {
    %c0_i32 = arith.constant 0 : i32
    %c0_i32_0 = arith.constant 0 : i32
    %c0_i32_1 = arith.constant 0 : i32
    return %c0_i32, %c0_i32_0 : i32, i32
  }
  func.func @transform_3(%arg0: i32) -> (i32, i32) {
    %c0_i32 = arith.constant 0 : i32
    %c0_i32_0 = arith.constant 0 : i32
    return %arg0, %c0_i32 : i32, i32
  }
}

</mosaic_0001>

<bundles_post_ra>
// kernel: tpu_custom_call.1
= control target key start
LH: loop header
LB: loop body
LE: loop exit
PB: predicated region body
PF: predicated region fallthrough
CT: control target
= control target key end

     0   :  { %8 = vsyncpa [#allocation3], 0  ;;  %s368_s0 = inlined_call_operand.hbm [shape: f32[16,256], index: 0, kind: input, shape index: {}]   ;;  %s369_s1 = inlined_call_operand.hbm [shape: f32[1,256], index: 1, kind: input, shape index: {}]   ;;  %s370_s2 = inlined_call_operand.hbm [shape: f32[1,256], index: 2, kind: input, shape index: {}]   ;;  %s371_s3 = inlined_call_operand.hbm [shape: f32[16,256], index: 3, kind: output, shape index: {}]  }
   0x1   :  { %9 = vsyncpa [#allocation6], 0  ;;  %s29_s14 = sshll.u32 %s369_s1, 4  ;;  %s30_s14 = int_to_ptr.hbm [resolvable:$true] %s29_s14 }
   0x2   :  { %10 = vsyncpa [#allocation4], 0  ;;  %s304_s15 = smov [#allocation5]   ;;  %s15_s19 = sshll.u32 %s368_s0, 4  ;;  %s16_s19 = int_to_ptr.hbm [resolvable:$true] %s15_s19 }
   0x3   :  { %s31_s16 = sshll.u32 %s304_s15, 4  ;;  %s305_s20 = smov [#allocation2]   ;;  %s32_s16 = int_to_ptr.vmem [resolvable:$true] %s31_s16 }
   0x4   :  { %34 = dma.hbm_to_vmem [thread:$0]  %s30_s14, 32, %s32_s16, [#allocation6]  }
   0x5   :  { %s17_s21 = sshll.u32 %s305_s20, 4  ;;  %s306_s22 = smov 256   ;;  %s18_s21 = int_to_ptr.vmem [resolvable:$true] %s17_s21 }
   0x6   :  { %s307_s23 = smov 16   ;;  %s40_s25 = sshll.u32 %s370_s2, 4  ;;  %s41_s25 = int_to_ptr.hbm [resolvable:$true] %s40_s25 }
   0x7   :  { %23 = dma.hbm_to_vmem [thread:$0]  %s16_s19, 512, %s18_s21, [#allocation3], %s306_s22, %s306_s22, %s307_s23  }
   0x8   :  { %s308_s26 = smov [#allocation7]  }
   0x9   :  { %s42_s27 = sshll.u32 %s308_s26, 4  ;;  %s43_s27 = int_to_ptr.vmem [resolvable:$true] %s42_s27 }
   0xa   :  { %45 = dma.hbm_to_vmem [thread:$0]  %s41_s25, 32, %s43_s27, [#allocation6]  }
   0xb   :  { %298 = dma.done.wait [#allocation3], 512  }
   0xc   :  { %299 = vsyncadd [#allocation3], 4294966784 }
   0xd   :  { %300 = dma.done.wait [#allocation6], 64  }
   0xe   :  { %301 = vsyncadd [#allocation6], 4294967232  ;;  %v58_v0 = vld [vmem:[#allocation2] sm:$0xff]  ;;  %v59_v1 = vld [vmem:[#allocation2 + $0x8] sm:$0xff]  ;;  %s309_s0 = smov [#allocation8]   ;;  %s174_s30 = sshll.u32 %s371_s3, 4  ;;  %s175_s30 = int_to_ptr.hbm [resolvable:$true] %s174_s30 }
   0xf   :  { %v64_v2 = vadd.f32 %v59_v1, %v58_v0  ;;  %v60_v3 = vld [vmem:[#allocation2 + $0x10] sm:$0xff]  ;;  %v61_v4 = vld [vmem:[#allocation2 + $0x18] sm:$0xff]  ;;  %v62_v50 = vld [vmem:[#allocation5] sm:$0x3]  ;;  %s172_s2 = sshll.u32 %s309_s0, 4  ;;  %s173_s2 = int_to_ptr.vmem [resolvable:$true] %s172_s2 }
  0x10   :  { %v67_v5 = vadd.f32 %v61_v4, %v60_v3  ;;  %v63_v53 = vld [vmem:[#allocation7] sm:$0x3]  ;;  %v147_v57 = vperm.slane %v62_v50, 0  ;;  %v148_v60 = vperm.slane %v62_v50, 1 }
  0x11   :  { %65 = vadd.xlane.f32.xlu0 %v64_v2  ;;  %v156_v62 = vperm.slane %v63_v53, 0  ;;  %v157_v2 = vperm.slane %v63_v53, 1 }
  0x19   :  { %68 = vadd.xlane.f32.xlu0 %v67_v5 }
  0x84   :  { %v66_v6 = vpop.xlane.xlu0 %65 }
  0x85   :  { %v70_v7 = vmul.f32 0.00390625, %v66_v6 }
  0x87   :  { %v342_v8 = vsub.f32 %v58_v0, %v70_v7  ;;  %v344_v9 = vsub.f32 %v59_v1, %v70_v7 }
  0x89   :  { %v76_v10 = vmul.f32 %v342_v8, %v342_v8  ;;  %v77_v11 = vmul.f32 %v344_v9, %v344_v9 }
  0x8b   :  { %v80_v12 = vadd.f32 %v77_v11, %v76_v10 }
  0x8c   :  { %v69_v13 = vpop.xlane.xlu0 %68 }
  0x8d   :  { %v71_v14 = vmul.f32 0.00390625, %v69_v13  ;;  %81 = vadd.xlane.f32.xlu1 %v80_v12 }
  0x8f   :  { %v350_v15 = vsub.f32 %v60_v3, %v71_v14  ;;  %v352_v16 = vsub.f32 %v61_v4, %v71_v14 }
  0x91   :  { %v78_v17 = vmul.f32 %v350_v15, %v350_v15  ;;  %v79_v18 = vmul.f32 %v352_v16, %v352_v16 }
  0x93   :  { %v83_v19 = vadd.f32 %v79_v18, %v78_v17 }
  0x95   :  { %84 = vadd.xlane.f32.xlu1 %v83_v19 }
 0x100   :  { %v82_v20 = vpop.xlane.xlu1 %81 }
 0x101   :  { %v86_v21 = vmul.f32 0.003921569, %v82_v20 }
 0x103   :  { %194 = vrsqrt.f32 %v86_v21  ;;  %vm95_vm0 = vcmp.eq.f32.partialorder %v86_v21, inf  ;;  %v98_v34 = vand.u32 2147483648, %v86_v21  ;;  %vm97_vm1 = vcmp.eq.f32.partialorder %v86_v21, 0.0 }
 0x108   :  { %v85_v22 = vpop.xlane.xlu1 %84 }
 0x109   :  { %v195_v23 = vpop.eup %194  ;;  %v87_v24 = vmul.f32 0.003921569, %v85_v22 }
 0x10a   :  { %v89_v25 = vmul.f32 %v195_v23, %v86_v21 }
 0x10b   :  { %196 = vrsqrt.f32 %v87_v24  ;;  %vm107_vm2 = vcmp.eq.f32.partialorder %v87_v24, inf  ;;  %v110_v42 = vand.u32 2147483648, %v87_v24  ;;  %vm109_vm3 = vcmp.eq.f32.partialorder %v87_v24, 0.0 }
 0x10c   :  { %v90_v26 = vmul.f32 %v195_v23, %v89_v25 }
 0x10e   :  { %v91_v27 = vmul.f32 0.5, %v90_v26 }
 0x110   :  { %v92_v28 = vsub.f32 1.5, %v91_v27 }
 0x111   :  { %v197_v29 = vpop.eup %196 }
 0x112   :  { %v93_v30 = vmul.f32 %v195_v23, %v92_v28  ;;  %v101_v31 = vmul.f32 %v197_v29, %v87_v24 }
 0x114   :  { %v94_v32 = vmul.f32 %v93_v30, %v86_v21  ;;  %v102_v33 = vmul.f32 %v197_v29, %v101_v31 }
 0x116   :  { %v96_v35 = vsel %vm95_vm0, %v86_v21, %v94_v32  ;;  %v103_v36 = vmul.f32 0.5, %v102_v33 }
 0x117   :  { %v99_v37 = vsel %vm97_vm1, %v98_v34, %v96_v35 }
 0x118   :  { %v112_v38 = vadd.f32 1e-06, %v99_v37  ;;  %v104_v39 = vsub.f32 1.5, %v103_v36 }
 0x11a   :  { %198 = vrcp.f32 %v112_v38  ;;  %v105_v40 = vmul.f32 %v197_v29, %v104_v39  ;;  %v125_v49 = vand.u32 2147483648, %v112_v38  ;;  %v123_v52 = vand.u32 2147483647, %v112_v38 }
 0x11b   :  { %vm119_vm5 = vweird.f32 %v112_v38 }
 0x11c   :  { %v106_v41 = vmul.f32 %v105_v40, %v87_v24  ;;  %v126_v56 = vor.u32 1.1754944e-38, %v125_v49  ;;  %vm124_vm7 = vcmp.eq.f32.partialorder %v123_v52, 8.507059e+37 }
 0x11e   :  { %v108_v43 = vsel %vm107_vm2, %v87_v24, %v106_v41 }
 0x11f   :  { %v111_v44 = vsel %vm109_vm3, %v110_v42, %v108_v43 }
 0x120   :  { %v199_v45 = vpop.eup %198  ;;  %v113_v46 = vadd.f32 1e-06, %v111_v44 }
 0x121   :  { %v115_v47 = vmul.f32 %v199_v45, %v112_v38  ;;  %vm120_vm4 = vweird.f32 %v199_v45 }
 0x122   :  { %200 = vrcp.f32 %v113_v46  ;;  %vm121_vm6 = vmor %vm119_vm5, %vm120_vm4  ;;  %v137_v3 = vand.u32 2147483647, %v113_v46  ;;  %v139_v4 = vand.u32 2147483648, %v113_v46  ;;  %vm133_vm9 = vweird.f32 %v113_v46 }
 0x123   :  { %v116_v48 = vsub.f32 1.0, %v115_v47 }
 0x124   :  { %v140_v13 = vor.u32 1.1754944e-38, %v139_v4  ;;  %vm138_vm11 = vcmp.eq.f32.partialorder %v137_v3, 8.507059e+37 }
 0x125   :  { %v117_v51 = vmul.f32 %v199_v45, %v116_v48 }
 0x127   :  { %v118_v54 = vadd.f32 %v199_v45, %v117_v51 }
 0x128   :  { %v201_v55 = vpop.eup %200 }
 0x129   :  { %v122_v58 = vsel %vm121_vm6, %v199_v45, %v118_v54  ;;  %v129_v59 = vmul.f32 %v201_v55, %v113_v46  ;;  %vm134_vm8 = vweird.f32 %v201_v55 }
 0x12a   :  { %v127_v61 = vsel %vm124_vm7, %v126_v56, %v122_v58  ;;  %vm135_vm10 = vmor %vm133_vm9, %vm134_vm8 }
 0x12b   :  { %v130_v63 = vsub.f32 1.0, %v129_v59  ;;  %v142_v0 = vmul.f32 %v127_v61, %v342_v8  ;;  %v143_v1 = vmul.f32 %v127_v61, %v344_v9 }
 0x12d   :  { %v131_v5 = vmul.f32 %v201_v55, %v130_v63  ;;  %v151_v6 = vmul.f32 %v147_v57, %v142_v0  ;;  %v152_v7 = vmul.f32 %v148_v60, %v143_v1 }
 0x12f   :  { %v132_v10 = vadd.f32 %v201_v55, %v131_v5  ;;  %v160_v11 = vadd.f32 %v156_v62, %v151_v6  ;;  %v161_v12 = vadd.f32 %v157_v2, %v152_v7 }
 0x131   :  { %v136_v14 = vsel %vm135_vm10, %v201_v55, %v132_v10  ;;  %164 = vst [vmem:[#allocation8] sm:$0xff] %v160_v11 }
 0x132   :  { %v141_v17 = vsel %vm138_vm11, %v140_v13, %v136_v14  ;;  %165 = vst [vmem:[#allocation8 + $0x8] sm:$0xff] %v161_v12 }
 0x133   :  { %v144_v8 = vmul.f32 %v141_v17, %v350_v15  ;;  %v145_v9 = vmul.f32 %v141_v17, %v352_v16 }
 0x135   :  { %v153_v18 = vmul.f32 %v147_v57, %v144_v8  ;;  %v154_v19 = vmul.f32 %v148_v60, %v145_v9 }
 0x137   :  { %v162_v20 = vadd.f32 %v156_v62, %v153_v18  ;;  %v163_v21 = vadd.f32 %v157_v2, %v154_v19 }
 0x139   :  { %166 = vst [vmem:[#allocation8 + $0x10] sm:$0xff] %v162_v20 }
 0x13a   :  { %167 = vst [vmem:[#allocation8 + $0x18] sm:$0xff] %v163_v21 }
 0x13b   :  { %180 = dma.vmem_to_hbm [thread:$0]  %s173_s2, 512, %s175_s30, [#allocation4], %s306_s22, %s306_s22, %s307_s23  }
 0x13c   :  { %302 = dma.done.wait [#allocation4], 512  }
 0x13d   :  { %303 = vsyncadd [#allocation4], 4294966784 }
 0x13e   :  { %185 = vsyncpa [#allocation3], 1 }
 0x13f   :  { %186 = vsyncpa [#allocation6], 1 }
 0x140   :  { %187 = vsyncpa [#allocation4], 1 }

</bundles_post_ra>
